<compile_context>
chip_gen: v7x
topology: tpu7x:2x2x1
jax: 0.10.0
libtpu: 0.0.40
codegen_flags: <defaults>
</compile_context>

<pallas_src>
import functools

import jax
import jax.numpy as jnp
from jax.experimental import pallas as pl
from jax.experimental.pallas import tpu as pltpu


def _bce_kernel(logit_ref, label_ref, out_ref, acc_ref, *,
                G, C, ignore_index, ignore_bg, spatial_size, s_tile,
                num_inner, num_s):
    p = pl.program_id(1)
    i = pl.program_id(2)
    GC = G * C

    @pl.when(i == 0)
    def _():
        acc_ref[...] = jnp.zeros_like(acc_ref)

    x = logit_ref[...].astype(jnp.float32)        # (G*C, s_tile)
    lab = label_ref[...].astype(jnp.int32)        # (G,   s_tile) widened here

    # Pixels that must contribute target 0 in every channel (background when
    # ignore_bg; ignore_index only if it collides with a real class id) are
    # remapped to -1 on the *small* label block so they never match a class.
    lab_m = lab
    if ignore_bg:
        lab_m = jnp.where(lab == 0, -1, lab_m)
    if ignore_index < C:          # 255 >= C in the default config -> no-op
        lab_m = jnp.where(lab == ignore_index, -1, lab_m)

    # Build the per-row "key" so a single full-size compare against the packed
    # row-id iota yields the bool one-hot target for all G groups at once.
    cls_rows = jax.lax.broadcasted_iota(jnp.int32, (GC, 1), 0)   # 0..G*C-1
    if G == 1:
        key = lab_m                                   # broadcasts in compare
    else:
        key = jnp.concatenate(
            [jnp.broadcast_to(lab_m[g:g + 1, :] + g * C, (C, s_tile))
             for g in range(G)], axis=0)              # (G*C, s_tile)
    tgt = key == cls_rows                             # bool, no astype

    # Numerically stable BCE-with-logits; x*t replaced by a single select:
    #   loss = max(x, 0) - where(t, x, 0) + log(1 + exp(-|x|))
    loss = (jnp.maximum(x, 0.0) - jnp.where(tgt, x, 0.0)
            + jnp.log1p(jnp.exp(-jnp.abs(x))))

    if spatial_size % s_tile == 0:
        # Common case (e.g. 512*512 images): no tail, no mask at all.
        acc_ref[...] += loss
    else:
        t_idx = p * num_inner + i                    # global spatial tile id
        is_tail = t_idx == (num_s - 1)

        @pl.when(jnp.logical_not(is_tail))
        def _():
            acc_ref[...] += loss

        @pl.when(is_tail)
        def _():
            col = (jax.lax.broadcasted_iota(jnp.int32, (1, s_tile), 1)
                   + t_idx * s_tile)
            # Keep this a true select: garbage/NaN in the padded tail columns
            # must not propagate into the sum.
            acc_ref[...] += jnp.where(col < spatial_size, loss, 0.0)

    @pl.when(i == num_inner - 1)
    def _():
        # Single cross-sublane/cross-lane reduction per (m, p); lane-dense
        # (1, 128) output slab.
        out_ref[...] = jnp.broadcast_to(
            jnp.sum(acc_ref[...], keepdims=True), out_ref.shape)


def bce_loss(logit, label, *, ignore_index=255, ignore_bg=True,
             vmem_budget_bytes=12 * 1024 * 1024):
    """BCELoss.forward(logit, label) with logit_old=None, 3-D label.

    logit: (N, C, H, W) float (any float dtype; cast to f32 in-kernel)
    label: (N, H, W) int
    returns scalar float32 (mean BCE-with-logits loss).
    """
    N, C, H, W = logit.shape
    assert label.shape == (N, H, W)
    S = H * W

    # --- batch-group packing: make the sublane (row) dim a multiple of 8 ----
    G = 1
    if C % 8 != 0:
        for g in range(2, 9):
            if (g * C) % 8 == 0 and N % g == 0:
                G = g
                break
    M = N // G
    GC = G * C

    # Free views of contiguous NCHW data -- no transpose, no pad, no copy.
    logit3 = logit.reshape(M, GC, S)
    if (not jnp.issubdtype(label.dtype, jnp.integer)
            or jnp.dtype(label.dtype).itemsize > 4):
        label = label.astype(jnp.int32)
    label3 = label.reshape(M, G, S)          # keep the narrow dtype for DMA

    # --- tile sizing budgeted on the in-kernel f32 working set --------------
    logit_item = jnp.dtype(logit.dtype).itemsize
    label_item = jnp.dtype(label3.dtype).itemsize
    K_TMP = 6  # live full-tile f32/int32 temporaries (x, key, tgt, loss, ...)
    per_col = (2 * GC * logit_item       # double-buffered logit block
               + 2 * G * label_item      # double-buffered label block
               + GC * 4                  # f32 accumulator scratch
               + K_TMP * GC * 4)         # in-body temporaries
    s_full = ((S + 127) // 128) * 128
    s_tile = max(128, min(s_full, (vmem_budget_bytes // per_col) // 128 * 128))
    num_s = pl.cdiv(S, s_tile)

    # --- optional second parallel axis over spatial chunks (v7x dual-TC) ----
    P = 2 if (M % 2 == 1 and num_s % 2 == 0) else 1
    num_inner = num_s // P

    kernel = functools.partial(
        _bce_kernel, G=G, C=C, ignore_index=ignore_index, ignore_bg=ignore_bg,
        spatial_size=S, s_tile=s_tile, num_inner=num_inner, num_s=num_s)

    partials = pl.pallas_call(
        kernel,
        out_shape=jax.ShapeDtypeStruct((M, P, 1, 128), jnp.float32),
        grid_spec=pltpu.PrefetchScalarGridSpec(
            num_scalar_prefetch=0,
            grid=(M, P, num_inner),
            in_specs=[
                pl.BlockSpec((None, GC, s_tile),
                             lambda m, p, i: (m, 0, p * num_inner + i)),
                pl.BlockSpec((None, G, s_tile),
                             lambda m, p, i: (m, 0, p * num_inner + i)),
            ],
            out_specs=pl.BlockSpec((None, None, 1, 128),
                                   lambda m, p, i: (m, p, 0, 0)),
            scratch_shapes=[pltpu.VMEM((GC, s_tile), jnp.float32)],
        ),
        compiler_params=pltpu.CompilerParams(
            dimension_semantics=("parallel", "parallel", "arbitrary"),
            vmem_limit_bytes=32 * 1024 * 1024,
        ),
    )(logit3, label3)

    total = N * C * S
    return jnp.sum(partials[:, :, 0, 0]) / jnp.float32(total)


def _bce_loss_ref(logit, label, ignore_index=255, ignore_bg=True):
    """Pure-JAX reference of the same forward."""
    N, C, H, W = logit.shape
    cls = jnp.arange(C, dtype=jnp.int32).reshape(1, C, 1, 1)
    lab = label.astype(jnp.int32)[:, None, :, :]
    tgt = (lab == cls)
    if ignore_bg:
        tgt = tgt & (cls != 0)
    tgt = (tgt & (lab != ignore_index)).astype(jnp.float32)
    x = logit.astype(jnp.float32)
    loss = jnp.maximum(x, 0.0) - x * tgt + jnp.log1p(jnp.exp(-jnp.abs(x)))
    return jnp.mean(loss)


if __name__ == "__main__":
    key = jax.random.PRNGKey(0)
    k1, k2 = jax.random.split(key)

    N, C, H, W = 2, 4, 16, 16
    logit = jax.random.normal(k1, (N, C, H, W), dtype=jnp.float32)
    # labels in [0, C) plus some ignore_index pixels
    label = jax.random.randint(k2, (N, H, W), 0, C, dtype=jnp.int32)
    label = label.at[:, :2, :2].set(255)  # sprinkle ignore_index

    out = bce_loss(logit, label)
    out = jax.block_until_ready(out)

    ref = _bce_loss_ref(logit, label)
    assert jnp.allclose(out, ref, atol=1e-5, rtol=1e-5), (out, ref)

    # TODO(synk): pos_weight, reduction='sum'/'none', the 4-D (soft) label
    # path and the logit_old (distillation) branch are not exercised by the
    # default config and are not implemented in the kernel.
    print("KERNEL_OK")
</pallas_src>

<mosaic_0001>
module attributes {stable_mosaic.version = 11 : i64} {
  func.func @_bce_kernel(%arg0: i32, %arg1: i32, %arg2: i32, %arg3: memref<1x8x256xf32, #tpu.memory_space<vmem>>, %arg4: memref<1x2x256xi32, #tpu.memory_space<vmem>>, %arg5: memref<1x1x1x128xf32, #tpu.memory_space<vmem>>, %arg6: memref<8x256xf32, #tpu.memory_space<vmem>>) attributes {dimension_semantics = [#tpu.dimension_semantics<parallel>, #tpu.dimension_semantics<parallel>, #tpu.dimension_semantics<arbitrary>], iteration_bounds = array<i64: 1, 1, 1>, scalar_prefetch = 0 : i64, scratch_operands = 1 : i64, tpu.core_type = #tpu.core_type<tc>, window_params = [{transform_indices = @transform_0, window_bounds = array<i64: 1, 8, 256>}, {transform_indices = @transform_1, window_bounds = array<i64: 1, 2, 256>}, {transform_indices = @transform_2, window_bounds = array<i64: 1, 1, 1, 128>}]} {
    %c0_i32 = arith.constant 0 : i32
    %0 = arith.cmpi eq, %arg2, %c0_i32 : i32
    %1 = arith.extui %0 : i1 to i32
    %c0_i32_0 = arith.constant 0 : i32
    %2 = arith.cmpi ne, %1, %c0_i32_0 : i32
    scf.if %2 {
      %cst_16 = arith.constant 0.000000e+00 : f32
      %42 = vector.broadcast %cst_16 : f32 to vector<8x256xf32>
      %c0_17 = arith.constant 0 : index
      %c0_18 = arith.constant 0 : index
      %43 = vector.load %arg6[%c0_17, %c0_18] : memref<8x256xf32, #tpu.memory_space<vmem>>, vector<8x256xf32>
      tpu.vector_store %arg6[%c0_17, %c0_18], %42 {strides = array<i32>} : memref<8x256xf32, #tpu.memory_space<vmem>>, vector<8x256xf32>,
    } else {
    }
    %c0 = arith.constant 0 : index
    %c0_1 = arith.constant 0 : index
    %c0_2 = arith.constant 0 : index
    %3 = vector.load %arg3[%c0, %c0_1, %c0_2] : memref<1x8x256xf32, #tpu.memory_space<vmem>>, vector<1x8x256xf32>
    %4 = vector.shape_cast %3 : vector<1x8x256xf32> to vector<8x256xf32>
    %c0_3 = arith.constant 0 : index
    %c0_4 = arith.constant 0 : index
    %c0_5 = arith.constant 0 : index
    %5 = vector.load %arg4[%c0_3, %c0_4, %c0_5] : memref<1x2x256xi32, #tpu.memory_space<vmem>>, vector<1x2x256xi32>
    %6 = vector.shape_cast %5 : vector<1x2x256xi32> to vector<2x256xi32>
    %c0_i32_6 = arith.constant 0 : i32
    %7 = vector.broadcast %c0_i32_6 : i32 to vector<2x256xi32>
    %8 = arith.cmpi eq, %6, %7 : vector<2x256xi32>
    %c-1_i32 = arith.constant -1 : i32
    %9 = vector.broadcast %c-1_i32 : i32 to vector<2x256xi32>
    %10 = arith.select %8, %9, %6 : vector<2x256xi1>, vector<2x256xi32>
    %11 = tpu.iota {dimensions = array<i32: 0>} : vector<8x1xi32>
    %12 = vector.extract_strided_slice %10 {offsets = [0, 0], sizes = [1, 256], strides = [1, 1]} : vector<2x256xi32> to vector<1x256xi32>
    %c0_i32_7 = arith.constant 0 : i32
    %13 = vector.broadcast %c0_i32_7 : i32 to vector<1x256xi32>
    %14 = arith.addi %12, %13 : vector<1x256xi32>
    %15 = vector.shape_cast %14 : vector<1x256xi32> to vector<1x256xi32>
    %16 = vector.broadcast %15 : vector<1x256xi32> to vector<4x256xi32>
    %17 = vector.extract_strided_slice %10 {offsets = [1, 0], sizes = [1, 256], strides = [1, 1]} : vector<2x256xi32> to vector<1x256xi32>
    %c4_i32 = arith.constant 4 : i32
    %18 = vector.broadcast %c4_i32 : i32 to vector<1x256xi32>
    %19 = arith.addi %17, %18 : vector<1x256xi32>
    %20 = vector.shape_cast %19 : vector<1x256xi32> to vector<1x256xi32>
    %21 = vector.broadcast %20 : vector<1x256xi32> to vector<4x256xi32>
    %22 = tpu.concatenate %16, %21 in 0 : vector<4x256xi32>, vector<4x256xi32> -> vector<8x256xi32>
    %23 = vector.broadcast %11 : vector<8x1xi32> to vector<8x256xi32>
    %24 = arith.cmpi eq, %22, %23 : vector<8x256xi32>
    %cst = arith.constant 0.000000e+00 : f32
    %25 = vector.broadcast %cst : f32 to vector<8x256xf32>
    %26 = arith.maximumf %4, %25 : vector<8x256xf32>
    %cst_8 = arith.constant 0.000000e+00 : f32
    %27 = vector.broadcast %cst_8 : f32 to vector<8x256xf32>
    %28 = arith.select %24, %4, %27 : vector<8x256xi1>, vector<8x256xf32>
    %29 = arith.subf %26, %28 : vector<8x256xf32>
    %30 = math.absf %4 : vector<8x256xf32>
    %cst_9 = arith.constant 0.000000e+00 : f32
    %31 = vector.broadcast %cst_9 : f32 to vector<8x256xf32>
    %32 = arith.subf %31, %30 : vector<8x256xf32>
    %33 = math.exp %32 : vector<8x256xf32>
    %34 = math.log1p %33 : vector<8x256xf32>
    %35 = arith.addf %29, %34 : vector<8x256xf32>
    %c0_10 = arith.constant 0 : index
    %c0_11 = arith.constant 0 : index
    %36 = vector.load %arg6[%c0_10, %c0_11] : memref<8x256xf32, #tpu.memory_space<vmem>>, vector<8x256xf32>
    %37 = arith.addf %36, %35 : vector<8x256xf32>
    %c0_12 = arith.constant 0 : index
    %c0_13 = arith.constant 0 : index
    %38 = vector.load %arg6[%c0_12, %c0_13] : memref<8x256xf32, #tpu.memory_space<vmem>>, vector<8x256xf32>
    tpu.vector_store %arg6[%c0_12, %c0_13], %37 {strides = array<i32>} : memref<8x256xf32, #tpu.memory_space<vmem>>, vector<8x256xf32>,
    %c0_i32_14 = arith.constant 0 : i32
    %39 = arith.cmpi eq, %arg2, %c0_i32_14 : i32
    %40 = arith.extui %39 : i1 to i32
    %c0_i32_15 = arith.constant 0 : i32
    %41 = arith.cmpi ne, %40, %c0_i32_15 : i32
    scf.if %41 {
      %c0_16 = arith.constant 0 : index
      %c0_17 = arith.constant 0 : index
      %42 = vector.load %arg6[%c0_16, %c0_17] : memref<8x256xf32, #tpu.memory_space<vmem>>, vector<8x256xf32>
      %43 = vector.shape_cast %42 : vector<8x256xf32> to vector<1x8x256xf32>
      %cst_18 = arith.constant dense<0.000000e+00> : vector<1xf32>
      %44 = vector.multi_reduction <add>, %43, %cst_18 [1, 2] : vector<1x8x256xf32> to vector<1xf32>
      %45 = vector.shape_cast %44 : vector<1xf32> to vector<1x1x1xf32>
      %46 = vector.extract %45[0, 0, 0] : f32 from vector<1x1x1xf32>
      %47 = vector.broadcast %46 : f32 to vector<1x1xf32>
      %48 = vector.shape_cast %47 : vector<1x1xf32> to vector<1x1xf32>
      %49 = vector.broadcast %48 : vector<1x1xf32> to vector<1x128xf32>
      %c0_19 = arith.constant 0 : index
      %c0_20 = arith.constant 0 : index
      %c0_21 = arith.constant 0 : index
      %c0_22 = arith.constant 0 : index
      %50 = vector.load %arg5[%c0_19, %c0_20, %c0_21, %c0_22] : memref<1x1x1x128xf32, #tpu.memory_space<vmem>>, vector<1x1x1x128xf32>
      %51 = vector.shape_cast %50 : vector<1x1x1x128xf32> to vector<1x128xf32>
      %52 = vector.shape_cast %49 : vector<1x128xf32> to vector<1x1x1x128xf32>
      tpu.vector_store %arg5[%c0_19, %c0_20, %c0_21, %c0_22], %52 {strides = array<i32>} : memref<1x1x1x128xf32, #tpu.memory_space<vmem>>, vector<1x1x1x128xf32>,
    } else {
    }
    return
  }
  func.func @transform_0(%arg0: i32, %arg1: i32, %arg2: i32) -> (i32, i32, i32) {
    %c1_i32 = arith.constant 1 : i32
    %0 = arith.muli %arg1, %c1_i32 : i32
    %1 = arith.addi %0, %arg2 : i32
    %c0_i32 = arith.constant 0 : i32
    %c0_i32_0 = arith.constant 0 : i32
    return %arg0, %c0_i32, %1 : i32, i32, i32
  }
  func.func @transform_1(%arg0: i32, %arg1: i32, %arg2: i32) -> (i32, i32, i32) {
    %c1_i32 = arith.constant 1 : i32
    %0 = arith.muli %arg1, %c1_i32 : i32
    %1 = arith.addi %0, %arg2 : i32
    %c0_i32 = arith.constant 0 : i32
    %c0_i32_0 = arith.constant 0 : i32
    return %arg0, %c0_i32, %1 : i32, i32, i32
  }
  func.func @transform_2(%arg0: i32, %arg1: i32, %arg2: i32) -> (i32, i32, i32, i32) {
    %c0_i32 = arith.constant 0 : i32
    %c0_i32_0 = arith.constant 0 : i32
    %c0_i32_1 = arith.constant 0 : i32
    return %arg0, %arg1, %c0_i32, %c0_i32_0 : i32, i32, i32, i32
  }
}

</mosaic_0001>

<bundles_post_ra>
// kernel: tpu_custom_call.1
= control target key start
LH: loop header
LB: loop body
LE: loop exit
PB: predicated region body
PF: predicated region fallthrough
CT: control target
= control target key end

     0   :  { %7 = vsyncpa [#allocation4], 0  ;;  %s311_s0 = inlined_call_operand.hbm [shape: f32[1,8,256], index: 0, kind: input, shape index: {}]   ;;  %s312_s1 = inlined_call_operand.hbm [shape: s32[1,2,256], index: 1, kind: input, shape index: {}]   ;;  %s313_s2 = inlined_call_operand.hbm [shape: f32[1,1,1,128], index: 2, kind: output, shape index: {}]  }
   0x1   :  { %8 = vsyncpa [#allocation7], 0 }
   0x2   :  { %9 = vsyncpa [#allocation5], 0  ;;  %s257_s9 = smov [#allocation3]   ;;  %s258_s11 = smov [#allocation6]  }
   0x3   :  { %s20_s10 = sshll.u32 %s257_s9, 4  ;;  %s34_s12 = sshll.u32 %s258_s11, 4  ;;  %s21_s10 = int_to_ptr.vmem [resolvable:$true] %s20_s10  ;;  %s35_s12 = int_to_ptr.vmem [resolvable:$true] %s34_s12 }
   0x4   :  { %s185_s15 = scalar_lea.hbm %s311_s0, 256 }
   0x5   :  { %p186_p0 = scmp.ne.s32.totalorder %s311_s0, %s185_s15  ;;  %p189_p1 = scmp.lt.u32.totalorder %s185_s15, %s311_s0 }
   0x7   :  { %p191_p2 = pnand %p189_p1, %p186_p0 }
   0x9   :  { %194 = shalt.err (!%p191_p2)
}
   0xa   :  { %s195_s20 = scalar_lea.vmem %s21_s10, 256  ;;  %p200_p4 = scmp.lt.s32.totalorder %s21_s10, %s21_s10 }
   0xb   :  { %p196_p3 = scmp.ne.s32.totalorder %s21_s10, %s195_s20  ;;  %p201_p5 = scmp.lt.s32.totalorder %s195_s20, %s195_s20 }
   0xd   :  { %p202_p6 = por %p201_p5, %p200_p4 }
   0xf   :  { %p203_p7 = pnand %p202_p6, %p196_p3 }
  0x11   :  { %206 = shalt.err (!%p203_p7)
}
  0x12   :  { %23 = dma.hbm_to_vmem [thread:$0]  %s311_s0, 256, %s21_s10, [#allocation4]  }
  0x13   :  { %s207_s25 = scalar_lea.hbm %s312_s1, 64 }
  0x14   :  { %p208_p8 = scmp.ne.s32.totalorder %s312_s1, %s207_s25  ;;  %p211_p9 = scmp.lt.u32.totalorder %s207_s25, %s312_s1 }
  0x16   :  { %p213_p10 = pnand %p211_p9, %p208_p8 }
  0x18   :  { %216 = shalt.err (!%p213_p10)
}
  0x19   :  { %s217_s30 = scalar_lea.vmem %s35_s12, 64  ;;  %p222_p12 = scmp.lt.s32.totalorder %s35_s12, %s35_s12 }
  0x1a   :  { %p218_p11 = scmp.ne.s32.totalorder %s35_s12, %s217_s30  ;;  %p223_p13 = scmp.lt.s32.totalorder %s217_s30, %s217_s30 }
  0x1c   :  { %p224_p0 = por %p223_p13, %p222_p12 }
  0x1e   :  { %p225_p1 = pnand %p224_p0, %p218_p11 }
  0x20   :  { %228 = shalt.err (!%p225_p1)
}
  0x21   :  { %37 = dma.hbm_to_vmem [thread:$0]  %s312_s1, 64, %s35_s12, [#allocation7]  }
  0x22   :  { %251 = dma.done.wait [#allocation4], 256  }
  0x23   :  { %252 = vsyncadd [#allocation4], 4294967040 }
  0x24   :  { %253 = dma.done.wait [#allocation7], 64  }
  0x25   :  { %254 = vsyncadd [#allocation7], 4294967232  ;;  %v54_v0 = vld [vmem:[#allocation3] sm:$0xff]  ;;  %v55_v1 = vld [vmem:[#allocation3 + $0x8] sm:$0xff]  ;;  %v59_v4 = vlaneseq  ;;  %vm94_vm1 = vcmask 1043456   ;;  %s259_s1 = smov [#allocation8]  }
  0x26   :  { %v56_v2 = vld [vmem:[#allocation6] sm:$0xf]  ;;  %v105_v3 = vand.u32 2147483647, %v54_v0  ;;  %v106_v5 = vand.u32 2147483647, %v55_v1 }
  0x27   :  { %vm57_vm0 = vcmp.eq.s32.totalorder %v56_v2, 0  ;;  %v60_v8 = vshrl.u32 %v59_v4, 7  ;;  %v99_v34 = vmax.f32 %v54_v0, 0.0  ;;  %v100_v37 = vmax.f32 %v55_v1, 0.0  ;;  %s162_s4 = sshll.u32 %s259_s1, 4  ;;  %s163_s4 = int_to_ptr.vmem [resolvable:$true] %s162_s4 }
  0x28   :  { %v107_v6 = vsub.f32 0.0, %v105_v3  ;;  %v108_v7 = vsub.f32 0.0, %v106_v5  ;;  %v58_v11 = vsel %vm57_vm0, 4294967295, %v56_v2  ;;  %s229_s6 = scalar_lea.vmem %s163_s4, 16  ;;  %s233_s7 = scalar_lea.vmem %s163_s4, 32 }
  0x29   :  { %v63_v12 = vsub.s32 0, %v60_v8  ;;  %v77_v13 = vadd.s32 4, %v58_v11  ;;  %v80_v14 = vsub.s32 1, %v60_v8  ;;  %v67_v15 = vsub.s32 2, %v60_v8  ;;  %p230_p2 = scmp.ne.s32.totalorder %s163_s4, %s229_s6  ;;  %p234_p3 = scmp.lt.s32.totalorder %s163_s4, %s163_s4 }
  0x2a   :  { %v109_v9 = vmul.f32 1.442695, %v107_v6  ;;  %v111_v10 = vmul.f32 1.442695, %v108_v7  ;;  %v84_v16 = vsub.s32 3, %v60_v8  ;;  %p235_p4 = scmp.lt.s32.totalorder %s233_s7, %s229_s6 }
  0x2b   :  { %v64_v17 = vrot.slane %v58_v11, %v63_v12  ;;  %v81_v18 = vrot.slane %v77_v13, %v80_v14  ;;  %v68_v19 = vrot.slane %v58_v11, %v67_v15 }
  0x2c   :  { %177 = vpow2.f32 %v109_v9  ;;  %v85_v20 = vrot.slane %v77_v13, %v84_v16  ;;  %p236_p5 = por %p235_p4, %p234_p3 }
  0x2d   :  { %179 = vpow2.f32 %v111_v10  ;;  %v72_v22 = vrot.slane %v64_v17, %v63_v12  ;;  %v89_v23 = vrot.slane %v81_v18, %v80_v14  ;;  %v76_v25 = vrot.slane %v68_v19, %v63_v12 }
  0x2e   :  { %v93_v26 = vrot.slane %v85_v20, %v80_v14  ;;  %p237_p6 = pnand %p236_p5, %p230_p2 }
  0x2f   :  { %v95_v29 = vsel %vm94_vm1, %v72_v22, %v89_v23 }
  0x30   :  { %v96_v31 = vsel %vm94_vm1, %v76_v25, %v93_v26  ;;  %vm97_vm2 = vcmp.eq.s32.totalorder %v95_v29, %v60_v8 }
  0x31   :  { %vm98_vm3 = vcmp.eq.s32.totalorder %v96_v31, %v60_v8  ;;  %v101_v38 = vsel %vm97_vm2, %v54_v0, 0.0 }
  0x32   :  { %v102_v40 = vsel %vm98_vm3, %v55_v1, 0.0  ;;  %v103_v43 = vsub.f32 %v99_v34, %v101_v38 }
  0x33   :  { %v104_v46 = vsub.f32 %v100_v37, %v102_v40 }
  0x36   :  { %v178_v21 = vpop.eup %177 }
  0x37   :  { %v180_v24 = vpop.eup %179  ;;  %v113_v27 = vadd.f32 1.0, %v178_v21  ;;  %v116_v30 = vmul.f32 -0.5, %v178_v21  ;;  %v119_v35 = vand.u32 2147483647, %v178_v21 }
  0x38   :  { %v122_v28 = vadd.f32 1.0, %v180_v24  ;;  %v125_v32 = vmul.f32 -0.5, %v180_v24  ;;  %v128_v39 = vand.u32 2147483647, %v180_v24 }
  0x39   :  { %181 = vlog2.f32 %v113_v27  ;;  %v117_v33 = vadd.f32 1.0, %v116_v30  ;;  %vm120_vm4 = vcmp.lt.f32.partialorder %v119_v35, 0.0004427343 }
  0x3a   :  { %183 = vlog2.f32 %v122_v28  ;;  %v126_v36 = vadd.f32 1.0, %v125_v32  ;;  %vm129_vm5 = vcmp.lt.f32.partialorder %v128_v39, 0.0004427343 }
  0x3b   :  { %v118_v41 = vmul.f32 %v178_v21, %v117_v33 }
  0x3c   :  { %v127_v44 = vmul.f32 %v180_v24, %v126_v36 }
  0x43   :  { %v182_v42 = vpop.eup %181 }
  0x44   :  { %v184_v45 = vpop.eup %183  ;;  %v115_v47 = vmul.f32 0.6931472, %v182_v42 }
  0x45   :  { %v124_v48 = vmul.f32 0.6931472, %v184_v45 }
  0x46   :  { %v121_v49 = vsel %vm120_vm4, %v118_v41, %v115_v47 }
  0x47   :  { %v130_v50 = vsel %vm129_vm5, %v127_v44, %v124_v48  ;;  %v131_v51 = vadd.f32 %v121_v49, %v103_v43 }
  0x48   :  { %v132_v52 = vadd.f32 %v130_v50, %v104_v46 }
  0x4a   :  { %v144_v53 = vadd.f32 %v132_v52, %v131_v51 }
  0x4c   :  { %145 = vadd.xlane.f32.xlu0 %v144_v53 }
  0xd9   :  { %v146_v54 = vpop.xlane.xlu0 %145 }
  0xda   :  { %v147_v55 = vrot.slane %v146_v54, 4 }
  0xdc   :  { %v148_v56 = vadd.f32 %v147_v55, %v146_v54 }
  0xde   :  { %v149_v57 = vrot.slane %v148_v56, 2 }
  0xe0   :  { %v150_v58 = vadd.f32 %v149_v57, %v148_v56 }
  0xe2   :  { %v151_v59 = vrot.slane %v150_v58, 1 }
  0xe4   :  { %v152_v60 = vadd.f32 %v151_v59, %v150_v58 }
  0xe6   :  { %172 = vpush %v152_v60 }
 0x117   :  { %s173_s5 = spop %172 }
 0x118   :  { %v154_v61 = vstv %s173_s5 }
 0x119   :  { %155 = vst [vmem:[#allocation8] sm:$0x1] %v154_v61 }
 0x11a   :  { %240 = shalt.err (!%p237_p6)
}
 0x11b   :  { %s241_s10 = scalar_lea.hbm %s313_s2, 16 }
 0x11c   :  { %p242_p7 = scmp.ne.s32.totalorder %s313_s2, %s241_s10  ;;  %p245_p8 = scmp.lt.u32.totalorder %s241_s10, %s313_s2 }
 0x11e   :  { %p247_p9 = pnand %p245_p8, %p242_p7 }
 0x120   :  { %250 = shalt.err (!%p247_p9)
}
 0x121   :  { %165 = dma.vmem_to_hbm [thread:$0]  %s163_s4, 16, %s313_s2, [#allocation5]  }
 0x122   :  { %255 = dma.done.wait [#allocation5], 16  }
 0x123   :  { %256 = vsyncadd [#allocation5], 4294967280 }
 0x124   :  { %169 = vsyncpa [#allocation4], 1 }
 0x125   :  { %170 = vsyncpa [#allocation7], 1 }
 0x126   :  { %171 = vsyncpa [#allocation5], 1 }

</bundles_post_ra>
